<compile_context>
chip_gen: v7x
topology: tpu7x:2x2x1
jax: 0.10.0
libtpu: 0.0.40
codegen_flags: <defaults>
</compile_context>

<pallas_src>
import math

import jax
import jax.numpy as jnp
from jax.experimental import pallas as pl
from jax.experimental.pallas import tpu as pltpu


def _interp_matrix(in_size: int, out_size: int) -> jnp.ndarray:
    """Row-interpolation matrix M (out_size, in_size) for align_corners=True
    linear interpolation: y = M @ x."""
    if out_size == 1:
        # PyTorch align_corners=True with output size 1 samples index 0.
        return jnp.zeros((1, in_size), jnp.float32).at[0, 0].set(1.0)
    dst = jnp.arange(out_size, dtype=jnp.float32)
    src = dst * (in_size - 1) / (out_size - 1)
    lo = jnp.clip(jnp.floor(src).astype(jnp.int32), 0, in_size - 1)
    hi = jnp.clip(lo + 1, 0, in_size - 1)
    frac = src - lo.astype(jnp.float32)
    m = (jax.nn.one_hot(lo, in_size, dtype=jnp.float32) * (1.0 - frac)[:, None]
         + jax.nn.one_hot(hi, in_size, dtype=jnp.float32) * frac[:, None])
    return m


def _make_resize_kernel(tb: int, h_first: bool):
    """Kernel over one block of tb (n,c) slabs.

    wh_ref : (H_out, H)   factor-scaled H-interp matrix (constant index_map -> resident)
    wwt_ref: (W, W_out)   W-interp matrix, transposed        (resident)
    x_ref  : (tb, H, W)   contiguous input slabs
    o_ref  : (tb, H_out, W_out)
    """

    def kernel(wh_ref, wwt_ref, x_ref, o_ref):
        wh = wh_ref[...]
        wwt = wwt_ref[...]
        # tb is a small static int (<= _MAX_TB) -> Python unroll keeps every
        # matmul visible to the scheduler.
        for b in range(tb):
            xb = x_ref[b]                                              # (H, W)
            if h_first:
                t = jnp.dot(wh, xb, preferred_element_type=jnp.float32)   # (H_out, W)
                y = jnp.dot(t, wwt, preferred_element_type=jnp.float32)   # (H_out, W_out)
            else:
                t = jnp.dot(xb, wwt, preferred_element_type=jnp.float32)  # (H, W_out)
                y = jnp.dot(wh, t, preferred_element_type=jnp.float32)    # (H_out, W_out)
            o_ref[b] = y.astype(o_ref.dtype)

    return kernel


_STEP_BYTES_TARGET = 2 << 20   # ~2 MiB of HBM traffic per grid step (roofline-friendly)
_MAX_TB = 32                   # bound for the static in-kernel unroll
_VMEM_BUDGET = 12 << 20        # comfortably under every generation's scoped default


def _choose_block_batch(nc, h, w, h_out, w_out, bpe):
    """Pick tb = #(n,c) slabs per grid step and estimate the VMEM footprint."""
    per_slab_io = (h * w + h_out * w_out) * bpe
    tb = int(max(1, min(nc, _MAX_TB, _STEP_BYTES_TARGET // max(per_slab_io, 1))))

    def vmem_bytes(t):
        io = 2 * t * (h * w + h_out * w_out) * bpe          # double-buffered x / out blocks
        mats = 2 * (h_out * h + w * w_out) * 4              # interp matrices (2 bufs, conservative)
        tmp = t * (max(h_out * w, h * w_out) + h_out * w_out) * 4  # f32 intermediates
        return io + mats + tmp

    while tb > 1 and vmem_bytes(tb) > _VMEM_BUDGET:
        tb -= 1
    # v7x has 2 TensorCores; keep >= 2 "parallel" grid steps whenever possible.
    if nc >= 2:
        tb = min(tb, int(pl.cdiv(nc, 2)))
    return tb, vmem_bytes(tb)


def resize_transform(x: jnp.ndarray, vel_resize: float) -> jnp.ndarray:
    """Pallas implementation of ResizeTransform.forward for ndims == 2.

    x: (N, C, H, W) vector field (NCHW, like PyTorch).
    """
    factor = 1.0 / vel_resize
    if factor == 1.0:
        return x
    if x.ndim != 4:
        # TODO(synk): trilinear (5-D) / linear (3-D) inputs not supported.
        raise NotImplementedError("only ndims==2 (NCHW) inputs are supported")

    N, C, H, W = x.shape
    # Same double-precision size math as PyTorch's interpolate(scale_factor=...).
    H_out = int(math.floor(H * factor))
    W_out = int(math.floor(W * factor))

    nc = N * C
    bpe = jnp.dtype(x.dtype).itemsize
    tb, vmem_est = _choose_block_batch(nc, H, W, H_out, W_out, bpe)
    grid = int(pl.cdiv(nc, tb))

    # Host-side constants (tiny): fold the scalar rescale into the H matrix.
    wh = (factor * _interp_matrix(H, H_out)).astype(jnp.float32)   # (H_out, H)
    wwt = _interp_matrix(W, W_out).T.astype(jnp.float32)           # (W, W_out)

    # FLOP-minimizing matmul order per slab.
    h_first = H_out * W * (H + W_out) <= H * W_out * (W + H_out)

    # Free reshape: (N, C, H, W) -> (nc, H, W); no relayout, no padding.
    xr = x.reshape(nc, H, W)

    vmem_limit = int(min(32 << 20, max(8 << 20, 2 * vmem_est + (2 << 20))))

    out = pl.pallas_call(
        _make_resize_kernel(tb, h_first),
        out_shape=jax.ShapeDtypeStruct((nc, H_out, W_out), x.dtype),
        grid_spec=pltpu.PrefetchScalarGridSpec(
            num_scalar_prefetch=0,
            grid=(grid,),
            in_specs=[
                pl.BlockSpec((H_out, H), lambda i: (0, 0)),       # resident H-interp
                pl.BlockSpec((W, W_out), lambda i: (0, 0)),       # resident W-interp
                pl.BlockSpec((tb, H, W), lambda i: (i, 0, 0)),    # slab block
            ],
            out_specs=pl.BlockSpec((tb, H_out, W_out), lambda i: (i, 0, 0)),
        ),
        compiler_params=pltpu.CompilerParams(
            dimension_semantics=("parallel",),
            vmem_limit_bytes=vmem_limit,
        ),
    )(wh, wwt, xr)

    return out.reshape(N, C, H_out, W_out)


def _reference(x, vel_resize):
    """Plain-JAX reference with identical math (align_corners=True bilinear)."""
    factor = 1.0 / vel_resize
    if factor == 1.0:
        return x
    N, C, H, W = x.shape
    H_out = int(math.floor(H * factor))
    W_out = int(math.floor(W * factor))
    wh = _interp_matrix(H, H_out)
    ww = _interp_matrix(W, W_out)
    y = jnp.einsum('oh,nchw->ncow', wh, x.astype(jnp.float32))
    y = jnp.einsum('pw,ncow->ncop', ww, y)
    return (factor * y).astype(x.dtype)


if __name__ == "__main__":
    key = jax.random.PRNGKey(0)
    # 2D vector fields: batch=2, channels=4, spatial 16x16
    x = jax.random.normal(key, (2, 4, 16, 16), dtype=jnp.float32)

    # Upsample: vel_resize=0.5 -> factor=2.0 -> 16x16 -> 32x32
    out_up = jax.block_until_ready(resize_transform(x, 0.5))
    ref_up = _reference(x, 0.5)
    assert out_up.shape == (2, 4, 32, 32), out_up.shape
    assert jnp.allclose(out_up, ref_up, atol=2e-5, rtol=2e-5), "upsample mismatch"

    # Downsample: vel_resize=2.0 -> factor=0.5 -> 16x16 -> 8x8
    out_dn = jax.block_until_ready(resize_transform(x, 2.0))
    ref_dn = _reference(x, 2.0)
    assert out_dn.shape == (2, 4, 8, 8), out_dn.shape
    assert jnp.allclose(out_dn, ref_dn, atol=2e-5, rtol=2e-5), "downsample mismatch"

    # Identity: factor == 1
    assert jnp.array_equal(resize_transform(x, 1.0), x)

    print("KERNEL_OK")
</pallas_src>

<mosaic_0001>
module attributes {stable_mosaic.version = 11 : i64} {
  func.func @kernel(%arg0: i32, %arg1: memref<32x16xf32, #tpu.memory_space<vmem>>, %arg2: memref<16x32xf32, #tpu.memory_space<vmem>>, %arg3: memref<4x16x16xf32, #tpu.memory_space<vmem>>, %arg4: memref<4x32x32xf32, #tpu.memory_space<vmem>>) attributes {dimension_semantics = [#tpu.dimension_semantics<parallel>], iteration_bounds = array<i64: 2>, scalar_prefetch = 0 : i64, scratch_operands = 0 : i64, tpu.core_type = #tpu.core_type<tc>, window_params = [{pipeline_mode = #tpu.pipeline_mode<synchronous>, transform_indices = @transform_0, window_bounds = array<i64: 32, 16>}, {pipeline_mode = #tpu.pipeline_mode<synchronous>, transform_indices = @transform_1, window_bounds = array<i64: 16, 32>}, {transform_indices = @transform_2, window_bounds = array<i64: 4, 16, 16>}, {transform_indices = @transform_3, window_bounds = array<i64: 4, 32, 32>}]} {
    %c0 = arith.constant 0 : index
    %c0_0 = arith.constant 0 : index
    %0 = vector.load %arg1[%c0, %c0_0] : memref<32x16xf32, #tpu.memory_space<vmem>>, vector<32x16xf32>
    %c0_1 = arith.constant 0 : index
    %c0_2 = arith.constant 0 : index
    %1 = vector.load %arg2[%c0_1, %c0_2] : memref<16x32xf32, #tpu.memory_space<vmem>>, vector<16x32xf32>
    %c0_3 = arith.constant 0 : index
    %c0_4 = arith.constant 0 : index
    %c0_5 = arith.constant 0 : index
    %2 = vector.load %arg3[%c0_3, %c0_4, %c0_5] : memref<4x16x16xf32, #tpu.memory_space<vmem>>, vector<1x16x16xf32>
    %3 = vector.shape_cast %2 : vector<1x16x16xf32> to vector<16x16xf32>
    %cst = arith.constant dense<0.000000e+00> : vector<32x16xf32>
    %4 = tpu.matmul %0, %3, %cst {dimension_numbers = #tpu.dot_dimension_numbers<[1], [0], [0], [1], [0, 0, 1, 1], [], []>} : vector<32x16xf32>, vector<16x16xf32>, vector<32x16xf32> -> vector<32x16xf32>
    %cst_6 = arith.constant dense<0.000000e+00> : vector<32x32xf32>
    %5 = tpu.matmul %4, %1, %cst_6 {dimension_numbers = #tpu.dot_dimension_numbers<[1], [0], [0], [1], [0, 0, 1, 1], [], []>} : vector<32x16xf32>, vector<16x32xf32>, vector<32x32xf32> -> vector<32x32xf32>
    %c0_7 = arith.constant 0 : index
    %c0_8 = arith.constant 0 : index
    %c0_9 = arith.constant 0 : index
    %6 = vector.load %arg4[%c0_7, %c0_8, %c0_9] : memref<4x32x32xf32, #tpu.memory_space<vmem>>, vector<1x32x32xf32>
    %7 = vector.shape_cast %6 : vector<1x32x32xf32> to vector<32x32xf32>
    %8 = vector.shape_cast %5 : vector<32x32xf32> to vector<1x32x32xf32>
    tpu.vector_store %arg4[%c0_7, %c0_8, %c0_9], %8 {strides = array<i32>} : memref<4x32x32xf32, #tpu.memory_space<vmem>>, vector<1x32x32xf32>,
    %c1 = arith.constant 1 : index
    %c0_10 = arith.constant 0 : index
    %c0_11 = arith.constant 0 : index
    %9 = vector.load %arg3[%c1, %c0_10, %c0_11] : memref<4x16x16xf32, #tpu.memory_space<vmem>>, vector<1x16x16xf32>
    %10 = vector.shape_cast %9 : vector<1x16x16xf32> to vector<16x16xf32>
    %cst_12 = arith.constant dense<0.000000e+00> : vector<32x16xf32>
    %11 = tpu.matmul %0, %10, %cst_12 {dimension_numbers = #tpu.dot_dimension_numbers<[1], [0], [0], [1], [0, 0, 1, 1], [], []>} : vector<32x16xf32>, vector<16x16xf32>, vector<32x16xf32> -> vector<32x16xf32>
    %cst_13 = arith.constant dense<0.000000e+00> : vector<32x32xf32>
    %12 = tpu.matmul %11, %1, %cst_13 {dimension_numbers = #tpu.dot_dimension_numbers<[1], [0], [0], [1], [0, 0, 1, 1], [], []>} : vector<32x16xf32>, vector<16x32xf32>, vector<32x32xf32> -> vector<32x32xf32>
    %c1_14 = arith.constant 1 : index
    %c0_15 = arith.constant 0 : index
    %c0_16 = arith.constant 0 : index
    %13 = vector.load %arg4[%c1_14, %c0_15, %c0_16] : memref<4x32x32xf32, #tpu.memory_space<vmem>>, vector<1x32x32xf32>
    %14 = vector.shape_cast %13 : vector<1x32x32xf32> to vector<32x32xf32>
    %15 = vector.shape_cast %12 : vector<32x32xf32> to vector<1x32x32xf32>
    tpu.vector_store %arg4[%c1_14, %c0_15, %c0_16], %15 {strides = array<i32>} : memref<4x32x32xf32, #tpu.memory_space<vmem>>, vector<1x32x32xf32>,
    %c2 = arith.constant 2 : index
    %c0_17 = arith.constant 0 : index
    %c0_18 = arith.constant 0 : index
    %16 = vector.load %arg3[%c2, %c0_17, %c0_18] : memref<4x16x16xf32, #tpu.memory_space<vmem>>, vector<1x16x16xf32>
    %17 = vector.shape_cast %16 : vector<1x16x16xf32> to vector<16x16xf32>
    %cst_19 = arith.constant dense<0.000000e+00> : vector<32x16xf32>
    %18 = tpu.matmul %0, %17, %cst_19 {dimension_numbers = #tpu.dot_dimension_numbers<[1], [0], [0], [1], [0, 0, 1, 1], [], []>} : vector<32x16xf32>, vector<16x16xf32>, vector<32x16xf32> -> vector<32x16xf32>
    %cst_20 = arith.constant dense<0.000000e+00> : vector<32x32xf32>
    %19 = tpu.matmul %18, %1, %cst_20 {dimension_numbers = #tpu.dot_dimension_numbers<[1], [0], [0], [1], [0, 0, 1, 1], [], []>} : vector<32x16xf32>, vector<16x32xf32>, vector<32x32xf32> -> vector<32x32xf32>
    %c2_21 = arith.constant 2 : index
    %c0_22 = arith.constant 0 : index
    %c0_23 = arith.constant 0 : index
    %20 = vector.load %arg4[%c2_21, %c0_22, %c0_23] : memref<4x32x32xf32, #tpu.memory_space<vmem>>, vector<1x32x32xf32>
    %21 = vector.shape_cast %20 : vector<1x32x32xf32> to vector<32x32xf32>
    %22 = vector.shape_cast %19 : vector<32x32xf32> to vector<1x32x32xf32>
    tpu.vector_store %arg4[%c2_21, %c0_22, %c0_23], %22 {strides = array<i32>} : memref<4x32x32xf32, #tpu.memory_space<vmem>>, vector<1x32x32xf32>,
    %c3 = arith.constant 3 : index
    %c0_24 = arith.constant 0 : index
    %c0_25 = arith.constant 0 : index
    %23 = vector.load %arg3[%c3, %c0_24, %c0_25] : memref<4x16x16xf32, #tpu.memory_space<vmem>>, vector<1x16x16xf32>
    %24 = vector.shape_cast %23 : vector<1x16x16xf32> to vector<16x16xf32>
    %cst_26 = arith.constant dense<0.000000e+00> : vector<32x16xf32>
    %25 = tpu.matmul %0, %24, %cst_26 {dimension_numbers = #tpu.dot_dimension_numbers<[1], [0], [0], [1], [0, 0, 1, 1], [], []>} : vector<32x16xf32>, vector<16x16xf32>, vector<32x16xf32> -> vector<32x16xf32>
    %cst_27 = arith.constant dense<0.000000e+00> : vector<32x32xf32>
    %26 = tpu.matmul %25, %1, %cst_27 {dimension_numbers = #tpu.dot_dimension_numbers<[1], [0], [0], [1], [0, 0, 1, 1], [], []>} : vector<32x16xf32>, vector<16x32xf32>, vector<32x32xf32> -> vector<32x32xf32>
    %c3_28 = arith.constant 3 : index
    %c0_29 = arith.constant 0 : index
    %c0_30 = arith.constant 0 : index
    %27 = vector.load %arg4[%c3_28, %c0_29, %c0_30] : memref<4x32x32xf32, #tpu.memory_space<vmem>>, vector<1x32x32xf32>
    %28 = vector.shape_cast %27 : vector<1x32x32xf32> to vector<32x32xf32>
    %29 = vector.shape_cast %26 : vector<32x32xf32> to vector<1x32x32xf32>
    tpu.vector_store %arg4[%c3_28, %c0_29, %c0_30], %29 {strides = array<i32>} : memref<4x32x32xf32, #tpu.memory_space<vmem>>, vector<1x32x32xf32>,
    return
  }
  func.func @transform_0(%arg0: i32) -> (i32, i32) {
    %c0_i32 = arith.constant 0 : i32
    %c0_i32_0 = arith.constant 0 : i32
    %c0_i32_1 = arith.constant 0 : i32
    return %c0_i32, %c0_i32_0 : i32, i32
  }
  func.func @transform_1(%arg0: i32) -> (i32, i32) {
    %c0_i32 = arith.constant 0 : i32
    %c0_i32_0 = arith.constant 0 : i32
    %c0_i32_1 = arith.constant 0 : i32
    return %c0_i32, %c0_i32_0 : i32, i32
  }
  func.func @transform_2(%arg0: i32) -> (i32, i32, i32) {
    %c0_i32 = arith.constant 0 : i32
    %c0_i32_0 = arith.constant 0 : i32
    %c0_i32_1 = arith.constant 0 : i32
    return %arg0, %c0_i32, %c0_i32_0 : i32, i32, i32
  }
  func.func @transform_3(%arg0: i32) -> (i32, i32, i32) {
    %c0_i32 = arith.constant 0 : i32
    %c0_i32_0 = arith.constant 0 : i32
    %c0_i32_1 = arith.constant 0 : i32
    return %arg0, %c0_i32, %c0_i32_0 : i32, i32, i32
  }
}

</mosaic_0001>

<bundles_post_ra>
// kernel: tpu_custom_call.1
= control target key start
LH: loop header
LB: loop body
LE: loop exit
PB: predicated region body
PF: predicated region fallthrough
CT: control target
= control target key end

     0   :  { %8 = vsyncpa [#allocation3], 0  ;;  %s1720_s0 = inlined_call_operand.vmem [shape: f32[32,16], index: 0, kind: input, shape index: {}]   ;;  %s1721_s1 = inlined_call_operand.vmem [shape: f32[16,32], index: 1, kind: input, shape index: {}]   ;;  %s1722_s2 = inlined_call_operand.hbm [shape: f32[8,16,16], index: 2, kind: input, shape index: {}]   ;;  %s1723_s3 = inlined_call_operand.hbm [shape: f32[8,32,32], index: 3, kind: output, shape index: {}]  }
   0x1   :  { %10 = vsyncpa [#allocation3 + $0x1], 0 }
   0x2   :  { %11 = vsyncpa [#allocation4], 0 }
   0x3   :  { %13 = vsyncpa [#allocation4 + $0x1], 0  ;;  %s1462_s12 = smov 0   ;;  %s1464_s13 = smov 0  }
   0x4   :  { %s1466_s14 = smov 0   ;;  %s1468_s15 = smov 0  }
   0x5 LB: > { %s1483_s16 = sadd.s32 4294967295, %s1434_s15   ;;  %s1058_s17 = sadd.s32 4294967294, %s1434_s15   ;;  %s1434_s15 = sphi %s1468_s15, %s1736_s15   ;;  %s1430_s14 = sphi %s1466_s14, %s1735_s14   ;;  %s1426_s13 = sphi %s1464_s13, %s1734_s13   ;;  %s1422_s12 = sphi %s1462_s12, %s1733_s12  }
   0x6   : > { %s1487_s18 = sadd.s32 1, %s1434_s15   ;;  %s68_s19 = sadd.s32 1, %s1430_s14 }
   0x7   : > { %s65_s20 = ssub.s32 %s1434_s15, %s1487_s18  ;;  %p75_p0 = scmp.ne.s32.totalorder %s1430_s14, %s1426_s13 }
   0x8   : > { %p66_p1 = scmp.eq.s32.totalorder %s65_s20, 0  ;;  %p76_p2 = scmp.eq.s32.totalorder %s1434_s15, 0 }
   0x9   : > { %p81_p3 = scmp.ne.s32.totalorder %s1426_s13, %s1422_s12  ;;  %p82_p4 = scmp.eq.s32.totalorder %s1483_s16, 0 }
   0xa   : > { %s1499_s21 = scalar_select %p66_p1, %s1430_s14, %s68_s19  }
   0xb   : > { %p1501_p5 = por %p76_p2, %p75_p0  ;;  %p1505_p6 = por %p82_p4, %p81_p3 }
   0xc   : > { %p105_p7 = scmp.eq.s32.totalorder %s1483_s16, 1  ;;  %p111_p8 = scmp.eq.s32.totalorder %s1058_s17, 1 }
   0xd   : > { %p1300_p10 = scmp.lt.s32.totalorder %s1434_s15, 2  ;;  %s137_s26 = sand.u32 1, %s1430_s14  }
   0xe   : > { %p1512_p11 = por %p105_p7, %p75_p0  ;;  %p1516_p12 = por %p111_p8, %p81_p3 }
   0xf   : > { %s1125_s27 = sshll.u32 %s1434_s15, 10  ;;  %s1061_s28 = sshll.u32 %s137_s26, 6 }
  0x10   : > { %s1727_s24 = scalar_select %p1512_p11, 1, 0 }
  0x11   : > { %s1728_s25 = scalar_select %p1516_p12, 1, 0 }
  0x12   : > { %s1525_s4 = scalar_lea.hbm %s1722_s2, %s1125_s27  ;;  %s141_s5 = scalar_lea.vmem [#allocation2], %s1061_s28 }
  0x13   : > { %s149_s6 = sshll.u32 %s141_s5, 4  ;;  %p1529_p13 = pnand %p1300_p10, %p1501_p5  ;;  %s1533_s6 = int_to_ptr.vmem [resolvable:$true] %s149_s6 }
  0x14   : > { %s1535_s8 = scalar_lea.sflag [#allocation3], %s137_s26  ;;  %s1338_s9 = scalar_lea.hbm %s1525_s4, 1024 }
  0x15   : > { %p1339_p0 = scmp.ne.s32.totalorder %s1525_s4, %s1338_s9  ;;  %p1340_p1 = pneg %p1529_p13 }
  0x16   : > { %s1343_s17 = scalar_lea.hbm %s1722_s2, 2048  ;;  %p1344_p4 = scmp.lt.u32.totalorder %s1525_s4, %s1722_s2 }
  0x17   : > { %p1341_p2 = pnand %p1340_p1, %p1339_p0  ;;  %p1345_p5 = scmp.lt.u32.totalorder %s1343_s17, %s1338_s9 }
  0x18   : > { %p1347_p8 = scmp.lt.u32.totalorder %s1338_s9, %s1525_s4 }
  0x19   : > { %p1342_p3 = pneg %p1341_p2  ;;  %p1346_p7 = por %p1345_p5, %p1344_p4 }
  0x1b   : > { %p1348_p10 = por %p1347_p8, %p1346_p7 }
  0x1d   : > { %p1349_p9 = pnand %p1348_p10, %p1342_p3 }
  0x1f   : > { %1352 = shalt.err (!%p1349_p9)
}
  0x20   : > { %s1353_s22 = scalar_lea.vmem %s1533_s6, 1024  ;;  %s1436_s26 = smov [#allocation2]  }
  0x21   : > { %p1354_p0 = scmp.ne.s32.totalorder %s1533_s6, %s1353_s22  ;;  %s1358_s27 = sshll.u32 %s1436_s26, 4  ;;  %s1359_s27 = int_to_ptr.vmem [resolvable:$false] %s1358_s27 }
  0x22   : > { %s1360_s28 = scalar_lea.vmem %s1359_s27, 2048  ;;  %p1361_p11 = scmp.lt.s32.totalorder %s1533_s6, %s1359_s27 }
  0x23   : > { %p1356_p2 = pnand %p1354_p0, %p1340_p1  ;;  %p1362_p4 = scmp.lt.s32.totalorder %s1360_s28, %s1353_s22 }
  0x25   : > { %p1357_p12 = pneg %p1356_p2  ;;  %p1363_p5 = por %p1362_p4, %p1361_p11 }
  0x27   : > { %p1364_p7 = pnand %p1363_p5, %p1357_p12 }
  0x29   : > { %1367 = shalt.err (!%p1364_p7)
}
  0x2a   : > { %s1437_s29 = smov 128   ;;  %s1438_s30 = smov 8  }
  0x2b   : > { %1295 = dma.hbm_to_vmem [thread:$0]  (!%p1529_p13), %s1525_s4, 1024, %s1533_s6, %s1535_s8, %s1437_s29, %s1437_s29, %s1438_s30  }
  0x2c   : > { %p1065_p9 = scmp.ge.s32.totalorder %s1434_s15, 1  ;;  %p157_p1 = scmp.lt.s32.totalorder %s1434_s15, 3 }
  0x2e   : > { %p158_p3 = pnand %p1065_p9, %p157_p1 }
  0x2f   : > { %s1566_s5 = sand.u32 (!%p158_p3), 1, %s1426_s13  }
  0x30   : > { %161 = sbr.rel (%p158_p3) target bundleno = 533 (0x215), region = 32  ;;  %s1066_s9 = sshll.u32 (!%p158_p3), %s1566_s5, 6 }
  0x31   : > { %s164_s10 = scalar_lea.sflag (!%p158_p3), [#allocation3], %s1566_s5  ;;  %s1570_s11 = scalar_lea.vmem (!%p158_p3), [#allocation2], %s1066_s9 }
  0x37   : > { %1413 = dma.done.wait (%p1505_p6), %s164_s10, 1024  }
  0x38   : > { %1415 = vsyncadd (%p1505_p6), %s164_s10, 4294966272  ;;  %vm200_vm0 = vcmask 130048   ;;  %v198_v0 = vld [vmem:[%s1570_s11] sm:$0xff]  ;;  %v199_v1 = vld [vmem:[%s1570_s11 + $0x8] sm:$0xff]  ;;  %s1067_s29 = sshll.u32 %s1566_s5, 7  ;;  %vm395_vm1 = vcmask 261120  }
  0x39   : > { %v192_v2 = vld [vmem:[%s1720_s0] sm:$0xff]  ;;  %v1256_v3 = vpack.c.bf16 %v199_v1, %v198_v0  ;;  %v1077_v5 = vld [vmem:[%s1570_s11 + $0x18] sm:$0xff]  ;;  %v1090_v7 = vld [vmem:[%s1570_s11 + $0x20] sm:$0xff]  ;;  %s1635_s30 = scalar_lea.vmem [#allocation5], %s1067_s29  ;;  %s1127_s9 = sshll.u32 %s1483_s16, 11 }
  0x3a   : > { %1180 = vmatprep.mubr.msk.f32.mxu0 %vm200_vm0, %v192_v2  ;;  %v1076_v4 = vld [vmem:[%s1570_s11 + $0x10] sm:$0xff]  ;;  %v1091_v8 = vld [vmem:[%s1570_s11 + $0x28] sm:$0xff]  ;;  %v193_v9 = vld [vmem:[%s1720_s0 + $0x8] sm:$0xff]  ;;  %s985_s10 = sshll.u32 %s1635_s30, 4  ;;  %s1670_s6 = scalar_lea.hbm %s1723_s3, %s1127_s9  ;;  %s1672_s10 = int_to_ptr.vmem [resolvable:$true] %s985_s10 }
  0x3b   : > { %v1264_v6 = vpack.c.bf16 %v1077_v5, %v1076_v4  ;;  %1257 = vmatprep.subr.bf16.mxu0 %v1256_v3  ;;  %v196_v10 = vld [vmem:[%s1721_s1] sm:$0xff]  ;;  %v197_v11 = vld [vmem:[%s1721_s1 + $0x8] sm:$0xff]  ;;  %v194_v12 = vld [vmem:[%s1720_s0 + $0x10] sm:$0xff]  ;;  %v1272_v13 = vpack.c.bf16 %v1091_v8, %v1090_v7  ;;  %s971_s16 = scalar_lea.sflag [#allocation4], %s1566_s5  ;;  %s1368_s23 = scalar_lea.vmem %s1672_s10, 2048 }
  0x3c   : > { %1259 = vmatpush3.bf16.msra.mxu0 %v1256_v3  ;;  %v1260_v14 = vpack.c.bf16 %v197_v11, %v196_v10  ;;  %v195_v15 = vld [vmem:[%s1720_s0 + $0x18] sm:$0xff]  ;;  %v1104_v16 = vld [vmem:[%s1570_s11 + $0x30] sm:$0xff]  ;;  %v1105_v17 = vld [vmem:[%s1570_s11 + $0x38] sm:$0xff]  ;;  %p1369_p6 = scmp.ne.s32.totalorder %s1672_s10, %s1368_s23  ;;  %p1730_p11 = scmp.ne.s32.totalorder %s1727_s24, 0 }
  0x3d   : > { %1265 = vmatprep.subr.bf16.mxu0 %v1264_v6  ;;  %v1280_v18 = vpack.c.bf16 %v1105_v17, %v1104_v16  ;;  %s1439_s7 = smov [#allocation5]  }
  0x3e   : > { %1261 = vmatprep.subr.bf16.mxu1 %v1260_v14  ;;  %p1370_p12 = pnand %p1369_p6, %p1730_p11  ;;  %s1372_s8 = sshll.u32 %s1439_s7, 4  ;;  %s1373_s8 = int_to_ptr.vmem [resolvable:$false] %s1372_s8 }
  0x3f   : > { %1181 = vmatmul.mubr.msk.f32.vlgmr.msra.gmra.mrb[0].mxu0 %vm200_vm0, %v193_v9  ;;  %1263 = vmatpush3.bf16.msra.mxu1 %v1260_v14  ;;  %s1374_s17 = scalar_lea.vmem %s1373_s8, 4096  ;;  %p1375_p8 = scmp.lt.s32.totalorder %s1672_s10, %s1373_s8 }
  0x40   : > { %1267 = vmatpush3.bf16.msra.mxu0 %v1264_v6  ;;  %1183 = vmatprep.mubr.msk.f32.mxu0 %vm200_vm0, %v194_v12  ;;  %p1371_p13 = pneg %p1370_p12  ;;  %p1376_p10 = scmp.lt.s32.totalorder %s1374_s17, %s1368_s23 }
  0x41   : > { %1273 = vmatprep.subr.bf16.mxu0 %v1272_v13  ;;  %1269 = vmatprep.subr.bf16.mxu1 %v1260_v14 }
  0x42   : > { %p1377_p0 = por %p1376_p10, %p1375_p8 }
  0x43   : > { %1184 = vmatmul.mubr.msk.f32.gmra.mrb[2].mxu0 %vm200_vm0, %v195_v15 }
  0x44   : > { %1200 = vmatprep.mubr.msk.f32.mxu0 %vm200_vm0, %v192_v2  ;;  %p1378_p2 = pnand %p1377_p0, %p1371_p13 }
  0x47   : > { %1201 = vmatmul.mubr.msk.f32.vlgmr.msra.gmra.mrb[4].mxu0 %vm200_vm0, %v193_v9 }
  0x48   : > { %1275 = vmatpush3.bf16.msra.mxu0 %v1272_v13  ;;  %1203 = vmatprep.mubr.msk.f32.mxu0 %vm200_vm0, %v194_v12 }
  0x49   : > { %1281 = vmatprep.subr.bf16.mxu0 %v1280_v18 }
  0x4b   : > { %1204 = vmatmul.mubr.msk.f32.gmra.mrb[6].mxu0 %vm200_vm0, %v195_v15 }
  0x4c   : > { %1220 = vmatprep.mubr.msk.f32.mxu0 %vm200_vm0, %v192_v2 }
  0x4f   : > { %1221 = vmatmul.mubr.msk.f32.vlgmr.msra.gmra.mrb[8].mxu0 %vm200_vm0, %v193_v9 }
  0x50   : > { %1283 = vmatpush3.bf16.msra.mxu0 %v1280_v18  ;;  %1223 = vmatprep.mubr.msk.f32.mxu0 %vm200_vm0, %v194_v12 }
  0x53   : > { %1224 = vmatmul.mubr.msk.f32.gmra.mrb[10].mxu0 %vm200_vm0, %v195_v15 }
  0x54   : > { %1240 = vmatprep.mubr.msk.f32.mxu0 %vm200_vm0, %v192_v2 }
  0x57   : > { %1241 = vmatmul.mubr.msk.f32.vlgmr.msra.gmra.mrb[12].mxu0 %vm200_vm0, %v193_v9 }
  0x58   : > { %1243 = vmatprep.mubr.msk.f32.mxu0 %vm200_vm0, %v194_v12 }
  0x5b   : > { %1244 = vmatmul.mubr.msk.f32.gmra.mrb[14].mxu0 %vm200_vm0, %v195_v15 }
 0x112   : > { %v1182_v19 = vpop.f32.mrb[0].mxu0 }
 0x113   : > { %v279_v20 = vpop.f32.mrb[1].mxu0 }
 0x114   : > { %1190 = vmatprep.mubr.msk.f32.mxu1 %vm200_vm0, %v279_v20 }
 0x115   : > { %1191 = vmatmul.mubr.msk.f32.vlgmr.msra.gmra.mrb[0].mxu1 %vm200_vm0, %v1182_v19 }
 0x116   : > { %v1185_v21 = vpop.f32.mrb[2].mxu0  ;;  %1271 = vmatpush3.bf16.msra.mxu1 %v1260_v14 }
 0x117   : > { %v289_v22 = vpop.f32.mrb[3].mxu0  ;;  %1277 = vmatprep.subr.bf16.mxu1 %v1260_v14 }
 0x118   : > { %1193 = vmatprep.mubr.msk.f32.mxu1 %vm200_vm0, %v289_v22 }
 0x119   : > { %1194 = vmatmul.mubr.msk.f32.gmra.mrb[2].mxu1 %vm200_vm0, %v1185_v21 }
 0x11a   : > { %v1202_v23 = vpop.f32.mrb[4].mxu0 }
 0x11b   : > { %v469_v24 = vpop.f32.mrb[5].mxu0 }
 0x11c   : > { %1210 = vmatprep.mubr.msk.f32.mxu1 %vm200_vm0, %v469_v24 }
 0x11d   : > { %1211 = vmatmul.mubr.msk.f32.vlgmr.msra.gmra.mrb[4].mxu1 %vm200_vm0, %v1202_v23 }
 0x11e   : > { %v1205_v25 = vpop.f32.mrb[6].mxu0  ;;  %1279 = vmatpush3.bf16.msra.mxu1 %v1260_v14 }
 0x11f   : > { %v479_v26 = vpop.f32.mrb[7].mxu0  ;;  %1285 = vmatprep.subr.bf16.mxu1 %v1260_v14 }
 0x120   : > { %1213 = vmatprep.mubr.msk.f32.mxu1 %vm200_vm0, %v479_v26 }
 0x121   : > { %1214 = vmatmul.mubr.msk.f32.gmra.mrb[6].mxu1 %vm200_vm0, %v1205_v25 }
 0x122   : > { %v1222_v27 = vpop.f32.mrb[8].mxu0 }
 0x123   : > { %v659_v28 = vpop.f32.mrb[9].mxu0 }
 0x124   : > { %1230 = vmatprep.mubr.msk.f32.mxu1 %vm200_vm0, %v659_v28 }
 0x125   : > { %1231 = vmatmul.mubr.msk.f32.vlgmr.msra.gmra.mrb[8].mxu1 %vm200_vm0, %v1222_v27 }
 0x126   : > { %v1225_v29 = vpop.f32.mrb[10].mxu0  ;;  %1287 = vmatpush3.bf16.msra.mxu1 %v1260_v14 }
 0x127   : > { %v669_v30 = vpop.f32.mrb[11].mxu0 }
 0x128   : > { %1233 = vmatprep.mubr.msk.f32.mxu1 %vm200_vm0, %v669_v30 }
 0x129   : > { %1234 = vmatmul.mubr.msk.f32.gmra.mrb[10].mxu1 %vm200_vm0, %v1225_v29 }
 0x12a   : > { %v1242_v31 = vpop.f32.mrb[12].mxu0 }
 0x12b   : > { %v849_v32 = vpop.f32.mrb[13].mxu0 }
 0x12c   : > { %1250 = vmatprep.mubr.msk.f32.mxu1 %vm200_vm0, %v849_v32 }
 0x12d   : > { %1251 = vmatmul.mubr.msk.f32.vlgmr.msra.gmra.mrb[12].mxu1 %vm200_vm0, %v1242_v31 }
 0x12e   : > { %v1245_v33 = vpop.f32.mrb[14].mxu0 }
 0x12f   : > { %v859_v34 = vpop.f32.mrb[15].mxu0 }
 0x130   : > { %1253 = vmatprep.mubr.msk.f32.mxu1 %vm200_vm0, %v859_v34 }
 0x131   : > { %1254 = vmatmul.mubr.msk.f32.gmra.mrb[14].mxu1 %vm200_vm0, %v1245_v33 }
 0x1e8   : > { %v1192_v35 = vpop.f32.mrb[0].mxu1 }
 0x1e9   : > { %397 = vst.msk [vmem:[%s1635_s30 + $0x8] sm:$0xff] %vm395_vm1, %v1192_v35  ;;  %v376_v36 = vpop.f32.mrb[1].mxu1 }
 0x1ea   : > { %396 = vst.msk [vmem:[%s1635_s30] sm:$0xff] %vm395_vm1, %v376_v36 }
 0x1ec   : > { %v1195_v37 = vpop.f32.mrb[2].mxu1 }
 0x1ed   : > { %399 = vst.msk [vmem:[%s1635_s30 + $0x18] sm:$0xff] %vm395_vm1, %v1195_v37  ;;  %v386_v38 = vpop.f32.mrb[3].mxu1 }
 0x1ee   : > { %398 = vst.msk [vmem:[%s1635_s30 + $0x10] sm:$0xff] %vm395_vm1, %v386_v38 }
 0x1f0   : > { %v1212_v39 = vpop.f32.mrb[4].mxu1 }
 0x1f1   : > { %1087 = vst.msk [vmem:[%s1635_s30 + $0x28] sm:$0xff] %vm395_vm1, %v1212_v39  ;;  %v566_v40 = vpop.f32.mrb[5].mxu1 }
 0x1f2   : > { %1086 = vst.msk [vmem:[%s1635_s30 + $0x20] sm:$0xff] %vm395_vm1, %v566_v40 }
 0x1f4   : > { %v1215_v41 = vpop.f32.mrb[6].mxu1 }
 0x1f5   : > { %1089 = vst.msk [vmem:[%s1635_s30 + $0x38] sm:$0xff] %vm395_vm1, %v1215_v41  ;;  %v576_v42 = vpop.f32.mrb[7].mxu1 }
 0x1f6   : > { %1088 = vst.msk [vmem:[%s1635_s30 + $0x30] sm:$0xff] %vm395_vm1, %v576_v42 }
 0x1f8   : > { %v1232_v43 = vpop.f32.mrb[8].mxu1 }
 0x1f9   : > { %1101 = vst.msk [vmem:[%s1635_s30 + $0x48] sm:$0xff] %vm395_vm1, %v1232_v43  ;;  %v756_v44 = vpop.f32.mrb[9].mxu1 }
 0x1fa   : > { %1100 = vst.msk [vmem:[%s1635_s30 + $0x40] sm:$0xff] %vm395_vm1, %v756_v44 }
 0x1fc   : > { %v1235_v45 = vpop.f32.mrb[10].mxu1 }
 0x1fd   : > { %1103 = vst.msk [vmem:[%s1635_s30 + $0x58] sm:$0xff] %vm395_vm1, %v1235_v45  ;;  %v766_v46 = vpop.f32.mrb[11].mxu1 }
 0x1fe   : > { %1102 = vst.msk [vmem:[%s1635_s30 + $0x50] sm:$0xff] %vm395_vm1, %v766_v46 }
 0x200   : > { %v1252_v47 = vpop.f32.mrb[12].mxu1 }
 0x201   : > { %1115 = vst.msk [vmem:[%s1635_s30 + $0x68] sm:$0xff] %vm395_vm1, %v1252_v47  ;;  %v946_v48 = vpop.f32.mrb[13].mxu1 }
 0x202   : > { %1114 = vst.msk [vmem:[%s1635_s30 + $0x60] sm:$0xff] %vm395_vm1, %v946_v48 }
 0x204   : > { %v1255_v49 = vpop.f32.mrb[14].mxu1 }
 0x205   : > { %1117 = vst.msk [vmem:[%s1635_s30 + $0x78] sm:$0xff] %vm395_vm1, %v1255_v49  ;;  %v956_v50 = vpop.f32.mrb[15].mxu1 }
 0x206   : > { %1116 = vst.msk [vmem:[%s1635_s30 + $0x70] sm:$0xff] %vm395_vm1, %v956_v50 }
 0x207   : > { %1381 = shalt.err (!%p1378_p2)
}
 0x208   : > { %s1382_s19 = scalar_lea.hbm %s1670_s6, 2048  ;;  %s1386_s26 = scalar_lea.hbm %s1723_s3, 4096 }
 0x209   : > { %p1383_p4 = scmp.ne.s32.totalorder %s1670_s6, %s1382_s19  ;;  %p1387_p9 = scmp.lt.u32.totalorder %s1670_s6, %s1723_s3 }
 0x20a   : > { %p1388_p1 = scmp.lt.u32.totalorder %s1386_s26, %s1382_s19  ;;  %p1390_p6 = scmp.lt.u32.totalorder %s1382_s19, %s1670_s6 }
 0x20b   : > { %p1384_p5 = pnand %p1383_p4, %p1730_p11 }
 0x20c   : > { %p1389_p3 = por %p1388_p1, %p1387_p9 }
 0x20d   : > { %p1385_p7 = pneg %p1384_p5 }
 0x20e   : > { %p1391_p12 = por %p1390_p6, %p1389_p3 }
 0x210   : > { %p1392_p13 = pnand %p1391_p12, %p1385_p7 }
 0x212   : > { %1395 = shalt.err (!%p1392_p13)
}
 0x213   : > { %s1440_s29 = smov 128   ;;  %s1441_s30 = smov 8  }
 0x214   : > { %1290 = dma.vmem_to_hbm [thread:$0]  (%p1730_p11), %s1672_s10, 2048, %s1670_s6, %s971_s16, %s1440_s29, %s1440_s29, %s1441_s30  }
 0x215 PF: > { %s1000_s9 = sand.u32 1, %s1422_s12   ;;  %p1731_p8 = scmp.ne.s32.totalorder %s1728_s25, 0 }
 0x216   : > { %p1732_p10 = scmp.ge.s32.totalorder %s1434_s15, 2  ;;  %s1001_s11 = scalar_lea.sflag [#allocation4], %s1000_s9 }
 0x218   : > { %p1297_p0 = pnand %p1732_p10, %p1731_p8 }
 0x21a   : > { %1417 = dma.done.wait (!%p1297_p0), %s1001_s11, 2048  }
 0x21b   : > { %1419 = vsyncadd (!%p1297_p0), %s1001_s11, 4294965248  ;;  %p16_p2 = scmp.ge.s32.totalorder %s1487_s18, 4   ;;  %s1733_s12 = smov %s1426_s13 }
 0x21c   : > { %s1734_s13 = smov %s1430_s14  ;;  %s1735_s14 = smov %s1499_s21 }
 0x21d   : > { %s1736_s15 = smov %s1487_s18  ;;  %18 = sbr.rel (!%p16_p2) target bundleno = 5 (0x5), region = 83 }
 0x224   :  { %1006 = vsyncpa [#allocation3], 1 }
 0x225   :  { %1008 = vsyncpa [#allocation3 + $0x1], 1 }
 0x226   :  { %1009 = vsyncpa [#allocation4], 1 }
 0x227   :  { %1011 = vsyncpa [#allocation4 + $0x1], 1 }

</bundles_post_ra>
